<compile_context>
chip_gen: v7x
topology: tpu7x:2x2x1
jax: 0.10.0
libtpu: 0.0.40
codegen_flags: <defaults>
</compile_context>

<pallas_src>
import math

import jax
import jax.numpy as jnp
from jax.experimental import pallas as pl
from jax.experimental.pallas import tpu as pltpu


def _round_up(x, m):
    return ((x + m - 1) // m) * m


def _block_diag(w):
    """(g, a, b) stack of per-group weights -> (g*a, g*b) block-diagonal."""
    g, a, b = w.shape
    eye = jnp.eye(g, dtype=w.dtype)
    return jnp.einsum("gab,gG->gaGb", w, eye).reshape(g * a, g * b)


def _pad_to(a, shape):
    pads = [(0, s - d) for d, s in zip(a.shape, shape)]
    if any(p for _, p in pads):
        a = jnp.pad(a, pads)
    return a


def _vmem_limits():
    """Generation-aware VMEM budgets (v7x: 64 MiB/TC; v5e/v6e: 128 MiB)."""
    cap = 128 * 1024 * 1024
    try:
        info = pltpu.get_tpu_info()
        cap = int(getattr(info, "vmem_capacity_bytes", cap) or cap)
    except Exception:
        pass
    budget = min((cap * 5) // 8, 64 * 1024 * 1024)   # tile-picker budget
    limit = min((cap * 7) // 8, 100 * 1024 * 1024)   # Mosaic scoped-vmem limit
    return int(budget), int(limit)


def _pick_tile_b(bk, t, h, h2p, dp, in_bytes, out_bytes, budget_bytes):
    """Batch-tile size: bounded by VMEM, targeting ~512-1024 MXU rows/step."""
    # Weights/biases are resident (constant index_map) but the pipeline still
    # double-buffers them; f32/bf16 intermediates scale with the row count.
    fixed = 2 * ((h * h2p + h2p * dp) * 2 + (h2p + dp) * 4)
    per_b = (2 * t * h * in_bytes        # input block, double buffered
             + 2 * t * dp * out_bytes    # output block, double buffered
             + t * h * 2                 # bf16 cast of x
             + t * h2p * (4 + 2)         # f32 h + bf16 copy fed to 2nd matmul
             + t * dp * 4)               # f32 o accumulator
    tile = max(1, (budget_bytes - fixed) // per_b)
    # >=512-row tiles already sit near the HBM roofline; bigger only costs VMEM.
    tile = min(tile, max(1, 1024 // t), bk)
    # Prefer a 256-aligned row count (MXU-native tile on v6e/v7x) when possible.
    if tile > 1 and (tile * t) % 256 != 0:
        step = 256 // math.gcd(256, t)
        if tile >= step:
            tile = (tile // step) * step
    return int(max(tile, 1))


# ----------------------------------------------------------------------------
# Pallas kernel: fused (1x1 conv -> LeakyReLU -> 1x1 conv) on block-diag weights
# ----------------------------------------------------------------------------
def _encoder_heads_kernel(x_ref, w1_ref, b1_ref, w2_ref, b2_ref, o_ref):
    # x_ref  : (TILE_B, T, H)      upstream dtype (f32) activation tile
    # w1_ref : (H, H2p)            bf16 block-diagonal conv1 weight (resident)
    # b1_ref : (1, H2p)            f32
    # w2_ref : (H2p, Dp)           bf16 block-diagonal conv2 weight (resident)
    # b2_ref : (1, Dp)             f32
    # o_ref  : (TILE_B, T, Dp)     bf16 output tile (lane-dense store)
    tb, t, h = x_ref.shape
    dp = o_ref.shape[-1]

    if tb == 1:
        x2 = x_ref[0]                          # (T, H), no row merge needed
    else:
        # Free row merge: wrapper guarantees T is sublane-aligned when tb > 1.
        x2 = x_ref[...].reshape(tb * t, h)

    x2 = x2.astype(w1_ref.dtype)               # per-tile cast, no HBM pre-pass
    hmid = jnp.dot(x2, w1_ref[...], preferred_element_type=jnp.float32)
    hmid = hmid + b1_ref[...]
    hmid = jnp.where(hmid > 0, hmid, 0.01 * hmid)   # LeakyReLU (slope 0.01), f32

    o = jnp.dot(hmid.astype(w2_ref.dtype), w2_ref[...],
                preferred_element_type=jnp.float32)
    o = (o + b2_ref[...]).astype(o_ref.dtype)

    if tb == 1:
        o_ref[0] = o
    else:
        o_ref[...] = o.reshape(tb, t, dp)


def encoder_heads_pallas(hidden_states, w1_bd, b1, w2_bd, b2, *, seq_rows,
                         out_dtype=jnp.bfloat16, tile_b=None):
    """Fused grouped-1x1-conv stack over the first `seq_rows` tokens.

    hidden_states : (B*k, S, H) activations (upstream dtype, e.g. f32).
    w1_bd         : (H, H2p)    block-diagonal conv1 weight (bf16, padded).
    b1            : (1, H2p)    f32 bias (padded).
    w2_bd         : (H2p, Dp)   block-diagonal conv2 weight (bf16, padded).
    b2            : (1, Dp)     f32 bias (padded).
    returns       : (B*k, seq_rows, Dp) in out_dtype, group-major channels.
    """
    bk, s, h = hidden_states.shape
    t = int(seq_rows)
    assert 0 < t <= s
    h2p = w1_bd.shape[1]
    dp = w2_bd.shape[1]
    assert w1_bd.shape[0] == h and w2_bd.shape[0] == h2p

    in_itemsize = jnp.dtype(hidden_states.dtype).itemsize
    row_align = max(8, 32 // max(1, in_itemsize))     # 8 (f32) / 16 (bf16)

    x = hidden_states
    if t % row_align != 0 and t != s:
        # Fallback only: the fused "read just the first T rows" block needs a
        # sublane-aligned T; otherwise slice up front (one extra copy).
        x = hidden_states[:, :t, :]
        s = t

    b1 = jnp.asarray(b1, jnp.float32).reshape(1, h2p)
    b2 = jnp.asarray(b2, jnp.float32).reshape(1, dp)

    budget, vmem_limit = _vmem_limits()
    if tile_b is None:
        tile_b = _pick_tile_b(bk, t, h, h2p, dp, in_itemsize,
                              jnp.dtype(out_dtype).itemsize, budget)
    if t % row_align != 0:
        tile_b = 1          # kernel then skips the (tile_b*t) row merge
    tile_b = int(max(1, min(tile_b, bk)))

    grid = (pl.cdiv(bk, tile_b),)

    cost = pl.CostEstimate(
        flops=2 * bk * t * (h * h2p + h2p * dp),
        transcendentals=0,
        bytes_accessed=(bk * t * h * in_itemsize
                        + bk * t * dp * jnp.dtype(out_dtype).itemsize
                        + (h * h2p + h2p * dp) * jnp.dtype(w1_bd.dtype).itemsize
                        + (h2p + dp) * 4),
    )

    return pl.pallas_call(
        _encoder_heads_kernel,
        out_shape=jax.ShapeDtypeStruct((bk, t, dp), out_dtype),
        grid=grid,
        in_specs=[
            pl.BlockSpec((tile_b, t, h), lambda i: (i, 0, 0)),   # skips rows >= T
            pl.BlockSpec((h, h2p), lambda i: (0, 0)),            # resident weights
            pl.BlockSpec((1, h2p), lambda i: (0, 0)),
            pl.BlockSpec((h2p, dp), lambda i: (0, 0)),
            pl.BlockSpec((1, dp), lambda i: (0, 0)),
        ],
        out_specs=pl.BlockSpec((tile_b, t, dp), lambda i: (i, 0, 0)),
        compiler_params=pltpu.CompilerParams(
            dimension_semantics=("parallel",),      # v7x: 2 TCs shard batch tiles
            vmem_limit_bytes=vmem_limit),
        cost_estimate=cost,
    )(x, w1_bd, b1, w2_bd, b2)


# ----------------------------------------------------------------------------
# KnowEncoder (JAX/Pallas version of the post-BERT forward)
# ----------------------------------------------------------------------------
class KnowEncoderPallas:
    def __init__(self, num_layers, dims, groups, num_prefix, hidden_size,
                 key, dtype=jnp.bfloat16):
        if dims % groups != 0:
            raise ValueError("Dims must divided by groups")
        if hidden_size % (2 * groups) != 0:
            raise ValueError("hidden_size must be divisible by 2*groups")
        assert num_prefix < 999 - 104
        self.num_layers = num_layers
        self.dims = dims
        self.groups = groups
        self.num_prefix = num_prefix
        self.hidden_size = hidden_size
        self.dtype = dtype

        ci_g = hidden_size // groups
        ch_g = (hidden_size // 2) // groups
        do_g = dims // groups

        k1, k2, k3, k4 = jax.random.split(key, 4)
        # Synthetic parameters in a per-group (in, out) layout.
        # NOTE: real torch Conv1d weights are (C_out, C_in/groups, 1); transpose
        # each group to (in, out) before _block_diag when porting checkpoints.
        self.w1 = jax.random.normal(k1, (groups, ci_g, ch_g), jnp.float32) * 0.1
        self.b1 = jax.random.normal(k2, (groups, ch_g), jnp.float32) * 0.1
        self.w2 = jax.random.normal(k3, (groups, ch_g, do_g), jnp.float32) * 0.1
        self.b2 = jax.random.normal(k4, (groups, do_g), jnp.float32) * 0.1

        # Block-diagonal dense weights, zero-padded to 128-multiples so every
        # matmul / store is lane-dense (no-op for realistic H/dims).
        h2 = hidden_size // 2
        self.h2_pad = _round_up(h2, 128)
        self.dims_pad = _round_up(dims, 128)
        self.w1_bd = _pad_to(_block_diag(self.w1),
                             (hidden_size, self.h2_pad)).astype(jnp.bfloat16)
        self.w2_bd = _pad_to(_block_diag(self.w2),
                             (self.h2_pad, self.dims_pad)).astype(jnp.bfloat16)
        self.b1_flat = _pad_to(self.b1.reshape(1, -1),
                               (1, self.h2_pad)).astype(jnp.float32)
        self.b2_flat = _pad_to(self.b2.reshape(1, -1),
                               (1, self.dims_pad)).astype(jnp.float32)

        # prefix_tokens buffer (unused without the real BERT, kept for parity)
        self.prefix_tokens = jnp.arange(
            104, 104 + self.num_prefix * num_layers)[None, :]

    def __call__(self, hidden_states, k=1):
        """hidden_states: (B*k, P*L + n, H) float — BERT last_hidden_state.

        output: tuple of num_layers arrays, each (B, k*num_prefix, dims), bf16.
        """
        # TODO(synk): HF BertModel + AutoTokenizer (and the prefix-token /
        # attention-mask concatenation they consume) have no clean in-script
        # Pallas equivalent; this consumes the BERT last_hidden_state directly.
        P, L, D = self.num_prefix, self.num_layers, self.dims
        bk = hidden_states.shape[0]
        B = bk // k
        T = P * L

        out = encoder_heads_pallas(
            hidden_states, self.w1_bd, self.b1_flat, self.w2_bd, self.b2_flat,
            seq_rows=T, out_dtype=self.dtype)          # (B*k, T, dims_pad)
        dp = out.shape[-1]

        # Layer-major reorder: under jit the reshape+transpose+reshape(+slice)
        # fuse into a single XLA copy over the small bf16 output (intentional
        # fallback to writing layer-major from the kernel, which would need a
        # risky in-kernel sublane repack).  Row t = p*L + l, matching torch.
        out = out.reshape(B, k, P, L, dp).transpose(3, 0, 1, 2, 4)
        out = out.reshape(L, B, k * P, dp)
        if dp != D:
            out = out[..., :D]                         # drop lane padding
        return tuple(out[i] for i in range(L))         # "unbind"

    # --- pure-JAX reference (grouped-conv formulation, f32) ------------------
    def reference_forward(self, hidden_states, k=1):
        P, L, D = self.num_prefix, self.num_layers, self.dims
        bk = hidden_states.shape[0]
        B = bk // k
        T = P * L
        g, ci_g, _ = self.w1.shape
        x = hidden_states[:, :T, :].astype(jnp.float32).reshape(bk * T, -1)
        xg = x.reshape(-1, g, ci_g)
        h = jnp.einsum("ngc,gch->ngh", xg, self.w1) + self.b1[None]
        h = jnp.where(h > 0, h, 0.01 * h)
        o = jnp.einsum("ngh,gho->ngo", h, self.w2) + self.b2[None]
        o = o.reshape(bk * T, -1).astype(self.dtype)
        o = o.reshape(B, k, P, L, D).transpose(3, 0, 1, 2, 4)
        o = o.reshape(L, B, k * P, D)
        return tuple(o[i] for i in range(L))


if __name__ == "__main__":
    # Small, module-consistent shapes (T = P*L = 8 keeps the fused slice path
    # sublane-aligned and exercises a multi-batch tile).
    num_layers, dims, groups, num_prefix = 4, 16, 4, 2
    hidden_size = 32
    B, k, n_tok = 2, 2, 8

    key = jax.random.PRNGKey(0)
    k_param, k_x = jax.random.split(key)

    enc = KnowEncoderPallas(num_layers, dims, groups, num_prefix,
                            hidden_size, k_param)

    seq_len = num_prefix * num_layers + n_tok          # 16
    hidden_states = jax.random.normal(
        k_x, (B * k, seq_len, hidden_size), jnp.float32)

    fwd = jax.jit(lambda hs: enc(hs, k=k))
    outs = jax.block_until_ready(fwd(hidden_states))

    # sanity: shapes / dtypes
    assert len(outs) == num_layers
    for o in outs:
        assert o.shape == (B, k * num_prefix, dims)
        assert o.dtype == jnp.bfloat16

    # numerical agreement with the original grouped-conv formulation (f32);
    # the kernel uses bf16 matmul operands with f32 accumulation.
    refs = enc.reference_forward(hidden_states, k=k)
    for got, ref in zip(outs, refs):
        assert jnp.allclose(got.astype(jnp.float32), ref.astype(jnp.float32),
                            atol=3e-2, rtol=3e-2), "mismatch vs reference"

    print("KERNEL_OK")
</pallas_src>

<mosaic_0001>
module attributes {stable_mosaic.version = 11 : i64} {
  func.func @_encoder_heads_kernel(%arg0: i32, %arg1: memref<4x8x32xf32, #tpu.memory_space<vmem>>, %arg2: memref<32x128xbf16, #tpu.memory_space<vmem>>, %arg3: memref<1x128xf32, #tpu.memory_space<vmem>>, %arg4: memref<128x128xbf16, #tpu.memory_space<vmem>>, %arg5: memref<1x128xf32, #tpu.memory_space<vmem>>, %arg6: memref<4x8x128xbf16, #tpu.memory_space<vmem>>) attributes {dimension_semantics = [#tpu.dimension_semantics<parallel>], iteration_bounds = array<i64: 1>, scalar_prefetch = 0 : i64, scratch_operands = 0 : i64, tpu.core_type = #tpu.core_type<tc>, window_params = [{transform_indices = @transform_0, window_bounds = array<i64: 4, 8, 32>}, {pipeline_mode = #tpu.pipeline_mode<synchronous>, transform_indices = @transform_1, window_bounds = array<i64: 32, 128>}, {pipeline_mode = #tpu.pipeline_mode<synchronous>, transform_indices = @transform_2, window_bounds = array<i64: 1, 128>}, {pipeline_mode = #tpu.pipeline_mode<synchronous>, transform_indices = @transform_3, window_bounds = array<i64: 128, 128>}, {pipeline_mode = #tpu.pipeline_mode<synchronous>, transform_indices = @transform_4, window_bounds = array<i64: 1, 128>}, {transform_indices = @transform_5, window_bounds = array<i64: 4, 8, 128>}]} {
    %c0 = arith.constant 0 : index
    %c0_0 = arith.constant 0 : index
    %c0_1 = arith.constant 0 : index
    %0 = vector.load %arg1[%c0, %c0_0, %c0_1] : memref<4x8x32xf32, #tpu.memory_space<vmem>>, vector<4x8x32xf32>
    %1 = vector.shape_cast %0 : vector<4x8x32xf32> to vector<32x32xf32>
    %2 = arith.truncf %1 : vector<32x32xf32> to vector<32x32xbf16>
    %c0_2 = arith.constant 0 : index
    %c0_3 = arith.constant 0 : index
    %3 = vector.load %arg2[%c0_2, %c0_3] : memref<32x128xbf16, #tpu.memory_space<vmem>>, vector<32x128xbf16>
    %cst = arith.constant dense<0.000000e+00> : vector<32x128xf32>
    %4 = tpu.matmul %2, %3, %cst {dimension_numbers = #tpu.dot_dimension_numbers<[1], [0], [0], [1], [0, 0, 1, 1], [], []>} : vector<32x32xbf16>, vector<32x128xbf16>, vector<32x128xf32> -> vector<32x128xf32>
    %c0_4 = arith.constant 0 : index
    %c0_5 = arith.constant 0 : index
    %5 = vector.load %arg3[%c0_4, %c0_5] : memref<1x128xf32, #tpu.memory_space<vmem>>, vector<1x128xf32>
    %6 = vector.broadcast %5 : vector<1x128xf32> to vector<32x128xf32>
    %7 = arith.addf %4, %6 : vector<32x128xf32>
    %cst_6 = arith.constant 0.000000e+00 : f32
    %8 = vector.broadcast %cst_6 : f32 to vector<32x128xf32>
    %9 = arith.cmpf ogt, %7, %8 : vector<32x128xf32>
    %cst_7 = arith.constant 0.00999999977 : f32
    %10 = vector.broadcast %cst_7 : f32 to vector<32x128xf32>
    %11 = arith.mulf %10, %7 : vector<32x128xf32>
    %12 = arith.select %9, %7, %11 : vector<32x128xi1>, vector<32x128xf32>
    %13 = arith.truncf %12 : vector<32x128xf32> to vector<32x128xbf16>
    %c0_8 = arith.constant 0 : index
    %c0_9 = arith.constant 0 : index
    %14 = vector.load %arg4[%c0_8, %c0_9] : memref<128x128xbf16, #tpu.memory_space<vmem>>, vector<128x128xbf16>
    %cst_10 = arith.constant dense<0.000000e+00> : vector<32x128xf32>
    %15 = tpu.matmul %13, %14, %cst_10 {dimension_numbers = #tpu.dot_dimension_numbers<[1], [0], [0], [1], [0, 0, 1, 1], [], []>} : vector<32x128xbf16>, vector<128x128xbf16>, vector<32x128xf32> -> vector<32x128xf32>
    %c0_11 = arith.constant 0 : index
    %c0_12 = arith.constant 0 : index
    %16 = vector.load %arg5[%c0_11, %c0_12] : memref<1x128xf32, #tpu.memory_space<vmem>>, vector<1x128xf32>
    %17 = vector.broadcast %16 : vector<1x128xf32> to vector<32x128xf32>
    %18 = arith.addf %15, %17 : vector<32x128xf32>
    %19 = arith.truncf %18 : vector<32x128xf32> to vector<32x128xbf16>
    %20 = vector.shape_cast %19 : vector<32x128xbf16> to vector<4x8x128xbf16>
    %c0_13 = arith.constant 0 : index
    %c0_14 = arith.constant 0 : index
    %c0_15 = arith.constant 0 : index
    %21 = vector.load %arg6[%c0_13, %c0_14, %c0_15] : memref<4x8x128xbf16, #tpu.memory_space<vmem>>, vector<4x8x128xbf16>
    tpu.vector_store %arg6[%c0_13, %c0_14, %c0_15], %20 {strides = array<i32>} : memref<4x8x128xbf16, #tpu.memory_space<vmem>>, vector<4x8x128xbf16>,
    return
  }
  func.func @transform_0(%arg0: i32) -> (i32, i32, i32) {
    %c0_i32 = arith.constant 0 : i32
    %c0_i32_0 = arith.constant 0 : i32
    %c0_i32_1 = arith.constant 0 : i32
    return %arg0, %c0_i32, %c0_i32_0 : i32, i32, i32
  }
  func.func @transform_1(%arg0: i32) -> (i32, i32) {
    %c0_i32 = arith.constant 0 : i32
    %c0_i32_0 = arith.constant 0 : i32
    %c0_i32_1 = arith.constant 0 : i32
    return %c0_i32, %c0_i32_0 : i32, i32
  }
  func.func @transform_2(%arg0: i32) -> (i32, i32) {
    %c0_i32 = arith.constant 0 : i32
    %c0_i32_0 = arith.constant 0 : i32
    %c0_i32_1 = arith.constant 0 : i32
    return %c0_i32, %c0_i32_0 : i32, i32
  }
  func.func @transform_3(%arg0: i32) -> (i32, i32) {
    %c0_i32 = arith.constant 0 : i32
    %c0_i32_0 = arith.constant 0 : i32
    %c0_i32_1 = arith.constant 0 : i32
    return %c0_i32, %c0_i32_0 : i32, i32
  }
  func.func @transform_4(%arg0: i32) -> (i32, i32) {
    %c0_i32 = arith.constant 0 : i32
    %c0_i32_0 = arith.constant 0 : i32
    %c0_i32_1 = arith.constant 0 : i32
    return %c0_i32, %c0_i32_0 : i32, i32
  }
  func.func @transform_5(%arg0: i32) -> (i32, i32, i32) {
    %c0_i32 = arith.constant 0 : i32
    %c0_i32_0 = arith.constant 0 : i32
    %c0_i32_1 = arith.constant 0 : i32
    return %arg0, %c0_i32, %c0_i32_0 : i32, i32, i32
  }
}

</mosaic_0001>

<bundles_post_ra>
// kernel: _lambda_.1
= control target key start
LH: loop header
LB: loop body
LE: loop exit
PB: predicated region body
PF: predicated region fallthrough
CT: control target
= control target key end

     0   :  { %10 = vsyncpa [#allocation3], 0  ;;  %s705_s0 = inlined_call_operand.hbm [shape: f32[4,16,32], index: 0, kind: input, shape index: {}]   ;;  %s706_s1 = inlined_call_operand.hbm [shape: bf16[32,128], index: 1, kind: input, shape index: {}]   ;;  %s707_s2 = inlined_call_operand.hbm [shape: f32[1,128], index: 2, kind: input, shape index: {}]   ;;  %s708_s3 = inlined_call_operand.hbm [shape: bf16[128,128], index: 3, kind: input, shape index: {}]   ;;  %s709_s4 = inlined_call_operand.hbm [shape: f32[1,128], index: 4, kind: input, shape index: {}]   ;;  %s710_s5 = inlined_call_operand.hbm [shape: bf16[4,8,128], index: 5, kind: output, shape index: {}]  }
   0x1   :  { %11 = vsyncpa [#allocation6], 0 }
   0x2   :  { %12 = vsyncpa [#allocation9], 0 }
   0x3   :  { %13 = vsyncpa [#allocation4], 0  ;;  %s580_s18 = smov [#allocation5]   ;;  %s440_s22 = scalar_lea.hbm %s706_s1, 256 }
   0x4   :  { %s31_s19 = sshll.u32 %s580_s18, 4  ;;  %p441_p0 = scmp.ne.s32.totalorder %s706_s1, %s440_s22  ;;  %s32_s19 = int_to_ptr.vmem [resolvable:$true] %s31_s19 }
   0x5   :  { %p444_p1 = scmp.lt.u32.totalorder %s440_s22, %s706_s1 }
   0x7   :  { %p446_p2 = pnand %p444_p1, %p441_p0 }
   0x9   :  { %449 = shalt.err (!%p446_p2)
}
   0xa   :  { %s450_s27 = scalar_lea.vmem %s32_s19, 256  ;;  %p455_p4 = scmp.lt.s32.totalorder %s32_s19, %s32_s19 }
   0xb   :  { %p451_p3 = scmp.ne.s32.totalorder %s32_s19, %s450_s27  ;;  %p456_p5 = scmp.lt.s32.totalorder %s450_s27, %s450_s27 }
   0xd   :  { %p457_p6 = por %p456_p5, %p455_p4 }
   0xf   :  { %p458_p7 = pnand %p457_p6, %p451_p3 }
  0x11   :  { %461 = shalt.err (!%p458_p7)
}
  0x12   :  { %s581_s28 = smov 64   ;;  %s582_s29 = smov 4  }
  0x13   :  { %37 = dma.hbm_to_vmem [thread:$0]  %s706_s1, 256, %s32_s19, [#allocation6], %s581_s28, %s581_s28, %s582_s29  }
  0x14   :  { %s583_s7 = smov [#allocation8]   ;;  %s584_s9 = smov [#allocation2]  }
  0x15   :  { %s53_s8 = sshll.u32 %s583_s7, 4  ;;  %s19_s10 = sshll.u32 %s584_s9, 4  ;;  %s54_s8 = int_to_ptr.vmem [resolvable:$true] %s53_s8  ;;  %s20_s10 = int_to_ptr.vmem [resolvable:$true] %s19_s10 }
  0x16   :  { %s462_s13 = scalar_lea.hbm %s708_s3, 1024 }
  0x17   :  { %p463_p8 = scmp.ne.s32.totalorder %s708_s3, %s462_s13  ;;  %p466_p9 = scmp.lt.u32.totalorder %s462_s13, %s708_s3 }
  0x19   :  { %p468_p10 = pnand %p466_p9, %p463_p8 }
  0x1b   :  { %471 = shalt.err (!%p468_p10)
}
  0x1c   :  { %s472_s1 = scalar_lea.vmem %s54_s8, 1024  ;;  %p477_p12 = scmp.lt.s32.totalorder %s54_s8, %s54_s8 }
  0x1d   :  { %p473_p11 = scmp.ne.s32.totalorder %s54_s8, %s472_s1  ;;  %p478_p13 = scmp.lt.s32.totalorder %s472_s1, %s472_s1 }
  0x1f   :  { %p479_p0 = por %p478_p13, %p477_p12 }
  0x21   :  { %p480_p1 = pnand %p479_p0, %p473_p11 }
  0x23   :  { %483 = shalt.err (!%p480_p1)
}
  0x24   :  { %59 = dma.hbm_to_vmem [thread:$0]  %s708_s3, 1024, %s54_s8, [#allocation9], %s581_s28, %s581_s28, %s582_s29  }
  0x25   :  { %s484_s22 = scalar_lea.hbm %s705_s0, 512  ;;  %s486_s27 = scalar_lea.hbm %s705_s0, 1024 }
  0x26   :  { %p485_p2 = scmp.ne.s32.totalorder %s705_s0, %s484_s22  ;;  %p487_p3 = scmp.lt.u32.totalorder %s486_s27, %s484_s22 }
  0x27   :  { %p488_p4 = scmp.lt.u32.totalorder %s484_s22, %s705_s0 }
  0x29   :  { %p489_p5 = por %p488_p4, %p487_p3 }
  0x2b   :  { %p490_p6 = pnand %p489_p5, %p485_p2 }
  0x2d   :  { %493 = shalt.err (!%p490_p6)
}
  0x2e   :  { %s494_s3 = scalar_lea.vmem %s20_s10, 512  ;;  %p499_p8 = scmp.lt.s32.totalorder %s20_s10, %s20_s10 }
  0x2f   :  { %p495_p7 = scmp.ne.s32.totalorder %s20_s10, %s494_s3  ;;  %p500_p9 = scmp.lt.s32.totalorder %s494_s3, %s494_s3 }
  0x31   :  { %p501_p10 = por %p500_p9, %p499_p8 }
  0x33   :  { %p502_p11 = pnand %p501_p10, %p495_p7 }
  0x35   :  { %505 = shalt.err (!%p502_p11)
}
  0x36   :  { %s585_s7 = smov 256   ;;  %s586_s8 = smov 128  }
  0x37   :  { %s587_s9 = smov 8   ;;  %s588_s13 = smov [#allocation7]  }
  0x38   :  { %25 = dma.hbm_to_vmem [thread:$0]  %s705_s0, 512, %s20_s10, [#allocation3], %s585_s7, %s586_s8, %s587_s9  }
  0x39   :  { %s44_s14 = sshll.u32 %s588_s13, 4  ;;  %s589_s15 = smov [#allocation10]   ;;  %s45_s14 = int_to_ptr.vmem [resolvable:$true] %s44_s14 }
  0x3a   :  { %s66_s16 = sshll.u32 %s589_s15, 4  ;;  %s506_s18 = scalar_lea.hbm %s707_s2, 16  ;;  %s67_s16 = int_to_ptr.vmem [resolvable:$true] %s66_s16 }
  0x3b   :  { %p507_p12 = scmp.ne.s32.totalorder %s707_s2, %s506_s18  ;;  %p510_p13 = scmp.lt.u32.totalorder %s506_s18, %s707_s2 }
  0x3d   :  { %p512_p0 = pnand %p510_p13, %p507_p12 }
  0x3f   :  { %515 = shalt.err (!%p512_p0)
}
  0x40   :  { %s516_s0 = scalar_lea.vmem %s45_s14, 16  ;;  %s520_s10 = scalar_lea.vmem %s45_s14, 32 }
  0x41   :  { %p517_p1 = scmp.ne.s32.totalorder %s45_s14, %s516_s0  ;;  %p521_p2 = scmp.lt.s32.totalorder %s45_s14, %s45_s14 }
  0x42   :  { %p522_p3 = scmp.lt.s32.totalorder %s520_s10, %s516_s0 }
  0x44   :  { %p523_p4 = por %p522_p3, %p521_p2 }
  0x46   :  { %p524_p5 = pnand %p523_p4, %p517_p1 }
  0x48   :  { %527 = shalt.err (!%p524_p5)
}
  0x49   :  { %47 = dma.hbm_to_vmem [thread:$0]  %s707_s2, 16, %s45_s14, [#allocation6]  }
  0x4a   :  { %s528_s27 = scalar_lea.hbm %s709_s4, 16 }
  0x4b   :  { %p529_p6 = scmp.ne.s32.totalorder %s709_s4, %s528_s27  ;;  %p532_p7 = scmp.lt.u32.totalorder %s528_s27, %s709_s4 }
  0x4d   :  { %p534_p8 = pnand %p532_p7, %p529_p6 }
  0x4f   :  { %537 = shalt.err (!%p534_p8)
}
  0x50   :  { %s538_s8 = scalar_lea.vmem %s67_s16, 16  ;;  %s542_s9 = scalar_lea.vmem %s67_s16, 32 }
  0x51   :  { %p539_p9 = scmp.ne.s32.totalorder %s67_s16, %s538_s8  ;;  %p543_p10 = scmp.lt.s32.totalorder %s67_s16, %s67_s16 }
  0x52   :  { %p544_p11 = scmp.lt.s32.totalorder %s542_s9, %s538_s8 }
  0x54   :  { %p545_p12 = por %p544_p11, %p543_p10 }
  0x56   :  { %p546_p13 = pnand %p545_p12, %p539_p9 }
  0x58   :  { %549 = shalt.err (!%p546_p13)
}
  0x59   :  { %69 = dma.hbm_to_vmem [thread:$0]  %s709_s4, 16, %s67_s16, [#allocation9]  }
  0x5a   :  { %572 = dma.done.wait [#allocation3], 512  }
  0x5b   :  { %573 = vsyncadd [#allocation3], 4294966784 }
  0x5c   :  { %574 = dma.done.wait [#allocation6], 272  }
  0x5d   :  { %575 = vsyncadd [#allocation6], 4294967024 }
  0x5e   :  { %576 = dma.done.wait [#allocation9], 1040  }
  0x5f   :  { %577 = vsyncadd [#allocation9], 4294966256  ;;  %v430_v0 = vld [vmem:[#allocation5] sm:$0xff]   ;;  %v431_v1 = vld [vmem:[#allocation5 + $0x8] sm:$0xff]   ;;  %vm115_vm0 = vcmask 261120   ;;  %s590_s4 = smov [#allocation11]  }
  0x60   :  { %391 = vmatprep.subr.bf16.mxu0 %v430_v0  ;;  %v86_v2 = vld [vmem:[#allocation2] sm:$0xff]  ;;  %v87_v3 = vld [vmem:[#allocation2 + $0x8] sm:$0xff]  ;;  %v88_v4 = vld [vmem:[#allocation2 + $0x10] sm:$0xff]  ;;  %s330_s12 = sshll.u32 %s590_s4, 4  ;;  %s331_s12 = int_to_ptr.vmem [resolvable:$true] %s330_s12 }
  0x61   :  { %392 = vmatpush3.bf16.msra.mxu0 %v430_v0  ;;  %v90_v5 = vpack.c.bf16 %v87_v3, %v86_v2  ;;  %v89_v6 = vld [vmem:[#allocation2 + $0x18] sm:$0xff]  ;;  %v434_v10 = vld [vmem:[#allocation8 + $0x10] sm:$0xff]   ;;  %v435_v11 = vld [vmem:[#allocation8 + $0x18] sm:$0xff]   ;;  %s550_s13 = scalar_lea.vmem %s331_s12, 256  ;;  %p555_p1 = scmp.lt.s32.totalorder %s331_s12, %s331_s12 }
  0x62   :  { %393 = vmatprep.subr.bf16.mxu0 %v431_v1  ;;  %v432_v7 = vld [vmem:[#allocation8] sm:$0xff]   ;;  %v433_v8 = vld [vmem:[#allocation8 + $0x8] sm:$0xff]   ;;  %v91_v9 = vpack.c.bf16 %v89_v6, %v88_v4  ;;  %v438_v14 = vld [vmem:[#allocation8 + $0x30] sm:$0xff]   ;;  %p551_p0 = scmp.ne.s32.totalorder %s331_s12, %s550_s13  ;;  %p556_p2 = scmp.lt.s32.totalorder %s550_s13, %s550_s13 }
  0x63   :  { %395 = vmatprep.mubr.msk.bf16.mxu0 %vm115_vm0, %v90_v5  ;;  %399 = vmatprep.subr.bf16.mxu1 %v432_v7  ;;  %v436_v12 = vld [vmem:[#allocation8 + $0x20] sm:$0xff]   ;;  %v437_v13 = vld [vmem:[#allocation8 + $0x28] sm:$0xff]   ;;  %v439_v15 = vld [vmem:[#allocation8 + $0x38] sm:$0xff]  }
  0x64   :  { %400 = vmatpush3.bf16.msra.mxu1 %v432_v7  ;;  %v344_v16 = vld [vmem:[#allocation7] ss:$0 sm:$0xff]  ;;  %v349_v36 = vld [vmem:[#allocation10] ss:$0 sm:$0xff]  ;;  %p557_p3 = por %p556_p2, %p555_p1 }
  0x65   :  { %394 = vmatpush3.bf16.msra.mxu0 %v431_v1  ;;  %401 = vmatprep.subr.bf16.mxu1 %v433_v8 }
  0x66   :  { %p558_p4 = pnand %p557_p3, %p551_p0 }
  0x68   :  { %396 = vmatmul.mubr.msk.bf16.vlgmr.msra.gmra.mrb[0].mxu0 %vm115_vm0, %v91_v9  ;;  %402 = vmatpush3.bf16.msra.mxu1 %v433_v8 }
  0x69   :  { %403 = vmatprep.subr.bf16.mxu1 %v434_v10 }
  0x6c   :  { %404 = vmatpush3.bf16.msra.mxu1 %v434_v10 }
  0x6d   :  { %405 = vmatprep.subr.bf16.mxu1 %v435_v11 }
  0x70   :  { %406 = vmatpush3.bf16.msra.mxu1 %v435_v11 }
  0x71   :  { %407 = vmatprep.subr.bf16.mxu1 %v436_v12 }
  0x74   :  { %408 = vmatpush3.bf16.msra.mxu1 %v436_v12 }
  0x75   :  { %409 = vmatprep.subr.bf16.mxu1 %v437_v13 }
  0x78   :  { %410 = vmatpush3.bf16.msra.mxu1 %v437_v13 }
  0x79   :  { %411 = vmatprep.subr.bf16.mxu1 %v438_v14 }
  0x7c   :  { %412 = vmatpush3.bf16.msra.mxu1 %v438_v14 }
  0x7d   :  { %413 = vmatprep.subr.bf16.mxu1 %v439_v15 }
  0x80   :  { %414 = vmatpush3.bf16.msra.mxu1 %v439_v15 }
 0x13b   :  { %v397_v17 = vpop.f32.mrb[0].mxu0 }
 0x13c   :  { %v165_v18 = vadd.f32 %v397_v17, %v344_v16  ;;  %v156_v19 = vpop.f32.mrb[1].mxu0 }
 0x13d   :  { %v157_v20 = vadd.f32 %v344_v16, %v156_v19  ;;  %v398_v21 = vpop.f32.mrb[2].mxu0 }
 0x13e   :  { %v177_v22 = vmul.f32 0.01, %v165_v18  ;;  %v168_v23 = vadd.f32 %v398_v21, %v344_v16  ;;  %v159_v24 = vpop.f32.mrb[3].mxu0  ;;  %vm173_vm1 = vcmp.gt.f32.partialorder %v165_v18, 0.0 }
 0x13f   :  { %v175_v25 = vmul.f32 0.01, %v157_v20  ;;  %v160_v26 = vadd.f32 %v344_v16, %v159_v24  ;;  %vm171_vm3 = vcmp.gt.f32.partialorder %v157_v20, 0.0 }
 0x140   :  { %vm174_vm2 = vcmp.gt.f32.partialorder %v168_v23, 0.0  ;;  %v178_v27 = vmul.f32 0.01, %v168_v23  ;;  %v181_v29 = vsel %vm173_vm1, %v165_v18, %v177_v22 }
 0x141   :  { %v176_v28 = vmul.f32 0.01, %v160_v26  ;;  %vm172_vm4 = vcmp.gt.f32.partialorder %v160_v26, 0.0  ;;  %v179_v31 = vsel %vm171_vm3, %v157_v20, %v175_v25 }
 0x142   :  { %v182_v30 = vsel %vm174_vm2, %v168_v23, %v178_v27 }
 0x143   :  { %v180_v32 = vsel %vm172_vm4, %v160_v26, %v176_v28  ;;  %v184_v33 = vpack.c.bf16 %v182_v30, %v181_v29 }
 0x144   :  { %v183_v34 = vpack.c.bf16 %v180_v32, %v179_v31 }
 0x146   :  { %415 = vmatprep.mubr.bf16.mxu1 %v183_v34 }
 0x147   :  { %416 = vmatmul.mubr.bf16.vlgmr.msra.gmra.mrb[0].mxu1 %v184_v33 }
 0x21a   :  { %v417_v35 = vpop.f32.mrb[0].mxu1 }
 0x21b   :  { %v290_v37 = vpop.f32.mrb[1].mxu1  ;;  %v299_v39 = vadd.f32 %v417_v35, %v349_v36 }
 0x21c   :  { %v418_v38 = vpop.f32.mrb[2].mxu1  ;;  %v291_v42 = vadd.f32 %v349_v36, %v290_v37 }
 0x21d   :  { %v302_v40 = vadd.f32 %v418_v38, %v349_v36  ;;  %v293_v41 = vpop.f32.mrb[3].mxu1 }
 0x21e   :  { %v294_v43 = vadd.f32 %v349_v36, %v293_v41 }
 0x21f   :  { %v374_v44 = vpack.c.bf16 %v302_v40, %v299_v39 }
 0x220   :  { %v369_v45 = vpack.c.bf16 %v294_v43, %v291_v42 }
 0x221   :  { %376 = vst [vmem:[#allocation11 + $0x8] sm:$0xff] %v374_v44  }
 0x222   :  { %370 = vst [vmem:[#allocation11] sm:$0xff] %v369_v45  }
 0x223   :  { %561 = shalt.err (!%p558_p4)
}
 0x224   :  { %s562_s16 = scalar_lea.hbm %s710_s5, 256 }
 0x225   :  { %p563_p5 = scmp.ne.s32.totalorder %s710_s5, %s562_s16  ;;  %p566_p6 = scmp.lt.u32.totalorder %s562_s16, %s710_s5 }
 0x227   :  { %p568_p7 = pnand %p566_p6, %p563_p5 }
 0x229   :  { %571 = shalt.err (!%p568_p7)
}
 0x22a   :  { %336 = dma.vmem_to_hbm [thread:$0]  %s331_s12, 256, %s710_s5, [#allocation4], %s581_s28, %s581_s28, %s582_s29  }
 0x22b   :  { %578 = dma.done.wait [#allocation4], 256  }
 0x22c   :  { %579 = vsyncadd [#allocation4], 4294967040 }
 0x22d   :  { %340 = vsyncpa [#allocation3], 1 }
 0x22e   :  { %341 = vsyncpa [#allocation6], 1 }
 0x22f   :  { %342 = vsyncpa [#allocation9], 1 }
 0x230   :  { %343 = vsyncpa [#allocation4], 1 }

</bundles_post_ra>
